<compile_context>
chip_gen: v5e
topology: v5e:2x2
jax: 0.10.0
libtpu: 0.0.40
codegen_flags: <defaults>
</compile_context>

<pallas_src>
import jax
import jax.numpy as jnp
from jax.experimental import pallas as pl
from jax.experimental.pallas import tpu as pltpu

NEG_SLOPE = 0.01  # nn.LeakyReLU default negative_slope


def _leaky_relu_f32(x):
    # leaky_relu(x) == max(x, a*x) for 0 < a < 1.  Applied on the f32
    # accumulator (v5e has no bf16 VALU); one op cheaper than cmp+mul+select.
    return jnp.maximum(x, NEG_SLOPE * x)


def _vmem_caps():
    """Returns (physical_vmem_bytes, usable_cap_bytes) for this generation."""
    phys = 64 << 20  # conservative fallback = v7x per-TC VMEM
    try:
        info = pltpu.get_tpu_info()
        phys = int(getattr(info, "vmem_capacity_bytes", phys)) or phys
    except Exception:
        pass
    # Use ~80% of the per-core VMEM (~102 MiB on 128 MiB v5e/v6e, ~51 MiB on
    # 64 MiB v7x).  Never request everything: leave compiler scratch headroom.
    cap = min((phys * 4) // 5, 108 << 20)
    return phys, cap


# ---------------------------------------------------------------------------
# Small-problem path: everything fits in VMEM -> a single grid step of
# batched-over-experts matmuls (zero per-step overhead, full DMA/MXU overlap).
# ---------------------------------------------------------------------------
def _experts_small_kernel(x_ref, w1_ref, w2_ref, w3_ref, o_ref):
    x = x_ref[...].astype(jnp.bfloat16)
    h1 = jnp.einsum('end,edh->enh', x, w1_ref[...].astype(jnp.bfloat16),
                    preferred_element_type=jnp.float32)
    h1 = _leaky_relu_f32(h1).astype(jnp.bfloat16)
    h2 = jnp.einsum('end,edh->enh', h1, w2_ref[...].astype(jnp.bfloat16),
                    preferred_element_type=jnp.float32)
    h2 = _leaky_relu_f32(h2).astype(jnp.bfloat16)
    out = jnp.einsum('end,edh->enh', h2, w3_ref[...].astype(jnp.bfloat16),
                     preferred_element_type=jnp.float32)
    o_ref[...] = out.astype(o_ref.dtype)


# ---------------------------------------------------------------------------
# General path: grid = (expert, token-tile).  Weight blocks are indexed only
# by the expert axis -> resident in VMEM across all token tiles.  f32 weights
# are cast to bf16 into VMEM scratch once per expert (token-tile axis is
# "arbitrary" so the n == 0 init is guaranteed to run first per expert).
# ---------------------------------------------------------------------------
def _tiled_body(x_ref, w1, w2, w3, o_ref):
    x = x_ref[...].astype(jnp.bfloat16)
    h1 = jnp.dot(x, w1[...], preferred_element_type=jnp.float32)
    h1 = _leaky_relu_f32(h1).astype(jnp.bfloat16)
    h2 = jnp.dot(h1, w2[...], preferred_element_type=jnp.float32)
    h2 = _leaky_relu_f32(h2).astype(jnp.bfloat16)
    out = jnp.dot(h2, w3[...], preferred_element_type=jnp.float32)
    o_ref[...] = out.astype(o_ref.dtype)


def _tiled_kernel_cast(x_ref, w1_ref, w2_ref, w3_ref, o_ref, w1b, w2b, w3b):
    @pl.when(pl.program_id(1) == 0)        # fresh expert -> recast weights once
    def _():
        w1b[...] = w1_ref[...].astype(jnp.bfloat16)
        w2b[...] = w2_ref[...].astype(jnp.bfloat16)
        w3b[...] = w3_ref[...].astype(jnp.bfloat16)
    _tiled_body(x_ref, w1b, w2b, w3b, o_ref)


def _tiled_kernel_nocast(x_ref, w1_ref, w2_ref, w3_ref, o_ref):
    _tiled_body(x_ref, w1_ref, w2_ref, w3_ref, o_ref)


def experts_forward(x, w1, w2, w3, *, token_tile=512, force_tiled=False):
    E, N, D = x.shape
    H = w1.shape[-1]
    assert w1.shape == (E, D, H)
    assert w2.shape == (E, H, H)
    assert w3.shape == (E, H, D)
    out_dtype = x.dtype

    _, vmem_cap = _vmem_caps()
    headroom = 4 << 20

    x_by = jnp.dtype(x.dtype).itemsize
    w_by = jnp.dtype(w1.dtype).itemsize
    o_by = jnp.dtype(out_dtype).itemsize
    w_elems = D * H + H * H + H * D
    cast_weights = w1.dtype != jnp.bfloat16

    cost = pl.CostEstimate(
        flops=2 * E * N * w_elems, transcendentals=0,
        bytes_accessed=E * N * D * (x_by + o_by) + E * w_elems * w_by)

    # ------------------ small path: a single grid step --------------------
    small_need = (
        E * N * D * x_by + E * w_elems * w_by          # whole inputs in VMEM
        + 2 * (E * N * D + E * w_elems)                # in-kernel bf16 copies
        + 2 * E * N * H * (4 + 2)                      # f32 + bf16 h1, h2
        + E * N * D * (4 + o_by)                       # f32 out + cast out
    )
    small_budget = min(vmem_cap // 2, 28 << 20)
    if not force_tiled and small_need <= small_budget:
        return pl.pallas_call(
            _experts_small_kernel,
            out_shape=jax.ShapeDtypeStruct((E, N, D), out_dtype),
            in_specs=[pl.BlockSpec(memory_space=pltpu.MemorySpace.VMEM)] * 4,
            out_specs=pl.BlockSpec(memory_space=pltpu.MemorySpace.VMEM),
            compiler_params=pltpu.CompilerParams(
                vmem_limit_bytes=int(min(vmem_cap, small_need + headroom))),
            cost_estimate=cost,
        )(x, w1, w2, w3)

    # ------------------ tiled path: grid = (E, N_tiles) -------------------
    tn = min(token_tile, N)
    if tn < N:
        tn = max(128, (tn // 128) * 128)   # lane/sublane (bf16 pack) friendly
        tn = min(tn, N)

    def tiled_need(tn_, wbufs):
        return (
            2 * tn_ * D * x_by                       # x blocks (double-buffered)
            + wbufs * w_elems * w_by                 # weight blocks
            + 2 * tn_ * D * o_by                     # out blocks (double-buffered)
            + 2 * tn_ * D                            # bf16 x copy
            + (2 * w_elems if cast_weights else 0)   # bf16 weight scratch
            + 2 * tn_ * H * (4 + 2)                  # f32 + bf16 h1, h2
            + 4 * tn_ * D                            # f32 out before final cast
        )

    # Pick (token tile, weight buffering) that fits this generation's VMEM.
    weight_buffers = 2
    while True:
        if tiled_need(tn, 2) + headroom <= vmem_cap:
            weight_buffers = 2
            break
        if tiled_need(tn, 1) + headroom <= vmem_cap:
            # Weights are resident across token tiles anyway; single buffering
            # only costs one DMA bubble per expert (amortized over n_tiles).
            weight_buffers = 1
            break
        if tn > 128:
            tn = max(128, ((tn // 2) // 128) * 128)
            continue
        weight_buffers = 1   # TODO(synk): H-column tiling for very large D.
        break

    n_tiles = pl.cdiv(N, tn)
    vmem_limit = int(min(
        vmem_cap, max(tiled_need(tn, weight_buffers) + headroom, 16 << 20)))

    w_kwargs = {} if weight_buffers == 2 else {"pipeline_mode": pl.Buffered(1)}
    in_specs = [
        pl.BlockSpec((pl.Squeezed(), tn, D), lambda e, n: (e, n, 0)),
        pl.BlockSpec((pl.Squeezed(), D, H), lambda e, n: (e, 0, 0), **w_kwargs),
        pl.BlockSpec((pl.Squeezed(), H, H), lambda e, n: (e, 0, 0), **w_kwargs),
        pl.BlockSpec((pl.Squeezed(), H, D), lambda e, n: (e, 0, 0), **w_kwargs),
    ]
    out_spec = pl.BlockSpec((pl.Squeezed(), tn, D), lambda e, n: (e, n, 0))

    if cast_weights:
        kernel = _tiled_kernel_cast
        scratch = [pltpu.VMEM((D, H), jnp.bfloat16),
                   pltpu.VMEM((H, H), jnp.bfloat16),
                   pltpu.VMEM((H, D), jnp.bfloat16)]
        # Token-tile axis must visit n == 0 first per expert (weight recast),
        # so it is "arbitrary"; experts still shard across v7x's two cores.
        semantics = ("parallel", "arbitrary")
    else:
        kernel = _tiled_kernel_nocast
        scratch = []
        semantics = ("parallel", "parallel")

    return pl.pallas_call(
        kernel,
        out_shape=jax.ShapeDtypeStruct((E, N, D), out_dtype),
        grid=(E, n_tiles),
        in_specs=in_specs,
        out_specs=out_spec,
        scratch_shapes=scratch,
        compiler_params=pltpu.CompilerParams(
            dimension_semantics=semantics,
            vmem_limit_bytes=vmem_limit,
        ),
        cost_estimate=cost,
    )(x, w1, w2, w3)


def experts_reference(x, w1, w2, w3):
    h1 = _leaky_relu_f32(jnp.einsum('end,edh->enh', x, w1))
    h2 = _leaky_relu_f32(jnp.einsum('end,edh->enh', h1, w2))
    return jnp.einsum('end,edh->enh', h2, w3)


if __name__ == "__main__":
    def _check(E, N, D, seed, **kw):
        H = 4 * D
        key = jax.random.PRNGKey(seed)
        kx, k1, k2, k3 = jax.random.split(key, 4)
        x = jax.random.normal(kx, (E, N, D), dtype=jnp.float32)
        w1 = jax.random.normal(k1, (E, D, H), dtype=jnp.float32)
        w2 = jax.random.normal(k2, (E, H, H), dtype=jnp.float32)
        w3 = jax.random.normal(k3, (E, H, D), dtype=jnp.float32)

        out = jax.block_until_ready(experts_forward(x, w1, w2, w3, **kw))
        ref = experts_reference(x, w1, w2, w3)
        assert out.shape == (E, N, D)
        # bf16 compute vs f32 reference -> loose, scale-relative tolerance.
        rel = float(jnp.max(jnp.abs(out - ref)) / (jnp.max(jnp.abs(ref)) + 1e-6))
        assert rel < 5e-2, f"mismatch vs reference (rel err {rel:.3e})"

    # Small config matching the module test: dim=32, num_experts=4, seq=8
    # (takes the single-step batched path).
    _check(E=4, N=8, D=32, seed=0)
    # Also exercise the general (expert, token-tile) tiled path.
    _check(E=2, N=256, D=128, seed=1, token_tile=128, force_tiled=True)

    print("KERNEL_OK")
</pallas_src>

<mosaic_0001>
module attributes {stable_mosaic.version = 11 : i64} {
  func.func @_experts_small_kernel(%arg0: memref<4x8x32xf32, #tpu.memory_space<vmem>>, %arg1: memref<4x32x128xf32, #tpu.memory_space<vmem>>, %arg2: memref<4x128x128xf32, #tpu.memory_space<vmem>>, %arg3: memref<4x128x32xf32, #tpu.memory_space<vmem>>, %arg4: memref<4x8x32xf32, #tpu.memory_space<vmem>>) attributes {dimension_semantics = [], scalar_prefetch = 0 : i64, scratch_operands = 0 : i64, tpu.core_type = #tpu.core_type<tc>} {
    %c0 = arith.constant 0 : index
    %c0_0 = arith.constant 0 : index
    %c0_1 = arith.constant 0 : index
    %0 = vector.load %arg0[%c0, %c0_0, %c0_1] : memref<4x8x32xf32, #tpu.memory_space<vmem>>, vector<4x8x32xf32>
    %1 = arith.truncf %0 : vector<4x8x32xf32> to vector<4x8x32xbf16>
    %c0_2 = arith.constant 0 : index
    %c0_3 = arith.constant 0 : index
    %c0_4 = arith.constant 0 : index
    %2 = vector.load %arg1[%c0_2, %c0_3, %c0_4] : memref<4x32x128xf32, #tpu.memory_space<vmem>>, vector<4x32x128xf32>
    %3 = arith.truncf %2 : vector<4x32x128xf32> to vector<4x32x128xbf16>
    "tpu.trace_start"() <{level = 10 : i32, message = "end,edh->enh"}> : () -> ()
    %cst = arith.constant dense<0.000000e+00> : vector<4x8x128xf32>
    %4 = tpu.matmul %1, %3, %cst {dimension_numbers = #tpu.dot_dimension_numbers<[2], [1], [1], [2], [0, 0, 0, 1, 1, 2], [0], [0]>} : vector<4x8x32xbf16>, vector<4x32x128xbf16>, vector<4x8x128xf32> -> vector<4x8x128xf32>
    "tpu.trace_stop"() : () -> ()
    %cst_5 = arith.constant 0.00999999977 : f32
    %5 = vector.broadcast %cst_5 : f32 to vector<4x8x128xf32>
    %6 = arith.mulf %5, %4 : vector<4x8x128xf32>
    %7 = arith.maximumf %4, %6 : vector<4x8x128xf32>
    %8 = arith.truncf %7 : vector<4x8x128xf32> to vector<4x8x128xbf16>
    %c0_6 = arith.constant 0 : index
    %c0_7 = arith.constant 0 : index
    %c0_8 = arith.constant 0 : index
    %9 = vector.load %arg2[%c0_6, %c0_7, %c0_8] : memref<4x128x128xf32, #tpu.memory_space<vmem>>, vector<4x128x128xf32>
    %10 = arith.truncf %9 : vector<4x128x128xf32> to vector<4x128x128xbf16>
    "tpu.trace_start"() <{level = 10 : i32, message = "end,edh->enh"}> : () -> ()
    %cst_9 = arith.constant dense<0.000000e+00> : vector<4x8x128xf32>
    %11 = tpu.matmul %8, %10, %cst_9 {dimension_numbers = #tpu.dot_dimension_numbers<[2], [1], [1], [2], [0, 0, 0, 1, 1, 2], [0], [0]>} : vector<4x8x128xbf16>, vector<4x128x128xbf16>, vector<4x8x128xf32> -> vector<4x8x128xf32>
    "tpu.trace_stop"() : () -> ()
    %cst_10 = arith.constant 0.00999999977 : f32
    %12 = vector.broadcast %cst_10 : f32 to vector<4x8x128xf32>
    %13 = arith.mulf %12, %11 : vector<4x8x128xf32>
    %14 = arith.maximumf %11, %13 : vector<4x8x128xf32>
    %15 = arith.truncf %14 : vector<4x8x128xf32> to vector<4x8x128xbf16>
    %c0_11 = arith.constant 0 : index
    %c0_12 = arith.constant 0 : index
    %c0_13 = arith.constant 0 : index
    %16 = vector.load %arg3[%c0_11, %c0_12, %c0_13] : memref<4x128x32xf32, #tpu.memory_space<vmem>>, vector<4x128x32xf32>
    %17 = arith.truncf %16 : vector<4x128x32xf32> to vector<4x128x32xbf16>
    "tpu.trace_start"() <{level = 10 : i32, message = "end,edh->enh"}> : () -> ()
    %cst_14 = arith.constant dense<0.000000e+00> : vector<4x8x32xf32>
    %18 = tpu.matmul %15, %17, %cst_14 {dimension_numbers = #tpu.dot_dimension_numbers<[2], [1], [1], [2], [0, 0, 0, 1, 1, 2], [0], [0]>} : vector<4x8x128xbf16>, vector<4x128x32xbf16>, vector<4x8x32xf32> -> vector<4x8x32xf32>
    "tpu.trace_stop"() : () -> ()
    %c0_15 = arith.constant 0 : index
    %c0_16 = arith.constant 0 : index
    %c0_17 = arith.constant 0 : index
    %19 = vector.load %arg4[%c0_15, %c0_16, %c0_17] : memref<4x8x32xf32, #tpu.memory_space<vmem>>, vector<4x8x32xf32>
    tpu.vector_store %arg4[%c0_15, %c0_16, %c0_17], %18 {strides = array<i32>} : memref<4x8x32xf32, #tpu.memory_space<vmem>>, vector<4x8x32xf32>,
    return
  }
}

</mosaic_0001>

<bundles_post_ra>
// kernel: tpu_custom_call.1
= control target key start
LH: loop header
LB: loop body
LE: loop exit
PB: predicated region body
PF: predicated region fallthrough
CT: control target
= control target key end

     0   :  { %9 = vsyncpa [#allocation3], 0  ;;  %s1531_s0 = inlined_call_operand.hbm [shape: f32[4,8,32], index: 0, kind: input, shape index: {}]   ;;  %s1532_s1 = inlined_call_operand.vmem [shape: f32[4,32,128], index: 1, kind: input, shape index: {}]   ;;  %s1533_s2 = inlined_call_operand.vmem [shape: f32[4,128,128], index: 2, kind: input, shape index: {}]   ;;  %s1534_s3 = inlined_call_operand.vmem [shape: f32[4,128,32], index: 3, kind: input, shape index: {}]   ;;  %s1535_s4 = inlined_call_operand.hbm [shape: f32[4,8,32], index: 4, kind: output, shape index: {}]  }
   0x1   :  { %10 = vsyncpa [#allocation4], 0  ;;  %s15_s17 = sshll.u32 %s1531_s0, 4  ;;  %s1039_s18 = smov [#allocation2]   ;;  %s16_s17 = int_to_ptr.hbm [resolvable:$true] %s15_s17 }
   0x2   :  { %s17_s19 = sshll.u32 %s1039_s18, 4  ;;  %s1040_s20 = smov 128   ;;  %s18_s19 = int_to_ptr.vmem [resolvable:$true] %s17_s19 }
   0x3   :  { %s1041_s21 = smov 8  }
   0x4   :  { %23 = dma.hbm_to_vmem [thread:$0]  %s16_s17, 512, %s18_s19, [#allocation3], %s1040_s20, %s1040_s20, %s1041_s21  }
   0x5   :  { %1035 = dma.done.wait [#allocation3], 512  }
   0x6   :  { %1036 = vsyncadd [#allocation3], 4294966784  ;;  %v53_v0 = vld [vmem:[%s1532_s1 + $0x50] sm:$0xff]  ;;  %v54_v1 = vld [vmem:[%s1532_s1 + $0x58] sm:$0xff]  ;;  %vm87_vm0 = vcmask 261120   ;;  %s966_s23 = sshll.u32 %s1535_s4, 4  ;;  %s967_s23 = int_to_ptr.hbm [resolvable:$true] %s966_s23 }
   0x7   :  { %v57_v2 = vld [vmem:[%s1532_s1 + $0x70] sm:$0xff]  ;;  %v69_v3 = vpack.c.bf16 %v53_v0, %v53_v0  ;;  %v70_v4 = vpack.c.bf16 %v54_v1, %v54_v1  ;;  %v58_v5 = vld [vmem:[%s1532_s1 + $0x78] sm:$0xff]  ;;  %v51_v7 = vld [vmem:[%s1532_s1 + $0x40] sm:$0xff] }
   0x8   :  { %v73_v6 = vpack.c.bf16 %v57_v2, %v57_v2  ;;  %v52_v8 = vld [vmem:[%s1532_s1 + $0x48] sm:$0xff]  ;;  %v74_v9 = vpack.c.bf16 %v58_v5, %v58_v5  ;;  %v67_v10 = vpack.c.bf16 %v51_v7, %v51_v7  ;;  %v55_v12 = vld [vmem:[%s1532_s1 + $0x60] sm:$0xff]  ;;  %v45_v14 = vld [vmem:[%s1532_s1 + $0x10] sm:$0xff] }
   0x9   :  { %v68_v11 = vpack.c.bf16 %v52_v8, %v52_v8  ;;  %v56_v13 = vld [vmem:[%s1532_s1 + $0x68] sm:$0xff]  ;;  %v138_v15 = vunpack.c.l.b16 %v69_v3  ;;  %v139_v16 = vunpack.c.l.b16 %v70_v4  ;;  %v71_v18 = vpack.c.bf16 %v55_v12, %v55_v12  ;;  %v46_v19 = vld [vmem:[%s1532_s1 + $0x18] sm:$0xff]  ;;  %v49_v20 = vld [vmem:[%s1532_s1 + $0x30] sm:$0xff] }
   0xa   :  { %v166_v17 = vunpack.c.l.b16 %v73_v6  ;;  %v167_v21 = vunpack.c.l.b16 %v74_v9  ;;  %v136_v22 = vunpack.c.l.b16 %v67_v10  ;;  %v72_v24 = vpack.c.bf16 %v56_v13, %v56_v13  ;;  %v50_v25 = vld [vmem:[%s1532_s1 + $0x38] sm:$0xff]  ;;  %v37_v26 = vld [vmem:[#allocation2 + $0x10] sm:$0xff]  ;;  %v43_v32 = vld [vmem:[%s1532_s1] sm:$0xff] }
   0xb   :  { %v137_v23 = vunpack.c.l.b16 %v68_v11  ;;  %v141_v27 = vpack.c.b16 %v139_v16, %v138_v15  ;;  %v164_v28 = vunpack.c.l.b16 %v71_v18  ;;  %v61_v29 = vpack.c.bf16 %v45_v14, %v45_v14  ;;  %v38_v31 = vld [vmem:[#allocation2 + $0x18] sm:$0xff]  ;;  %v44_v37 = vld [vmem:[%s1532_s1 + $0x8] sm:$0xff]  ;;  %v47_v38 = vld [vmem:[%s1532_s1 + $0x20] sm:$0xff] }
   0xc   :  { %v62_v30 = vpack.c.bf16 %v46_v19, %v46_v19  ;;  %v169_v33 = vpack.c.b16 %v167_v21, %v166_v17  ;;  %v165_v35 = vunpack.c.l.b16 %v72_v24  ;;  %v65_v36 = vpack.c.bf16 %v49_v20, %v49_v20  ;;  %v48_v43 = vld [vmem:[%s1532_s1 + $0x28] sm:$0xff]  ;;  %v1122_v44 = vld [vmem:[#allocation2] sm:$0xff]  ;;  %v214_v50 = vld [vmem:[%s1533_s2 + $0x70] sm:$0xff] }
   0xd   :  { %v140_v34 = vpack.c.b16 %v137_v23, %v136_v22  ;;  %153 = vmatpush.bf16.msra.mxu2 %v141_v27  ;;  %v81_v39 = vunpack.c.l.b16 %v61_v29  ;;  %v66_v41 = vpack.c.bf16 %v50_v25, %v50_v25  ;;  %v41_v42 = vpack.c.bf16 %v37_v26, %v37_v26  ;;  %v1124_v45 = vld [vmem:[#allocation2 + $0x8] sm:$0xff]  ;;  %v215_v55 = vld [vmem:[%s1533_s2 + $0x78] sm:$0xff]  ;;  %v230_v56 = vld [vmem:[%s1533_s2 + $0xf0] sm:$0xff] }
   0xe   :  { %v82_v40 = vunpack.c.l.b16 %v62_v30  ;;  %181 = vmatpush.bf16.msra.mxu3 %v169_v33  ;;  %v168_v46 = vpack.c.b16 %v165_v35, %v164_v28  ;;  %v110_v47 = vunpack.c.l.b16 %v65_v36  ;;  %v42_v48 = vpack.c.bf16 %v38_v31, %v38_v31  ;;  %v231_v57 = vld [vmem:[%s1533_s2 + $0xf8] sm:$0xff]  ;;  %v246_v62 = vld [vmem:[%s1533_s2 + $0x170] sm:$0xff]  ;;  %v212_v14 = vld [vmem:[%s1533_s2 + $0x60] sm:$0xff] }
   0xf   :  { %v59_v49 = vpack.c.bf16 %v43_v32, %v43_v32  ;;  %v111_v52 = vunpack.c.l.b16 %v66_v41  ;;  %v60_v53 = vpack.c.bf16 %v44_v37, %v44_v37  ;;  %v63_v54 = vpack.c.bf16 %v47_v38, %v47_v38  ;;  %v247_v63 = vld [vmem:[%s1533_s2 + $0x178] sm:$0xff]  ;;  %v262_v8 = vld [vmem:[%s1533_s2 + $0x1f0] sm:$0xff]  ;;  %v213_v15 = vld [vmem:[%s1533_s2 + $0x68] sm:$0xff] }
  0x10   :  { %v84_v51 = vpack.c.b16 %v82_v40, %v81_v39  ;;  %v64_v59 = vpack.c.bf16 %v48_v43, %v48_v43  ;;  %v39_v60 = vpack.c.bf16 %v1122_v44, %v1122_v44  ;;  %v40_v61 = vpack.c.bf16 %v1124_v45, %v1124_v45  ;;  %v263_v9 = vld [vmem:[%s1533_s2 + $0x1f8] sm:$0xff]  ;;  %v228_v20 = vld [vmem:[%s1533_s2 + $0xe0] sm:$0xff]  ;;  %v229_v25 = vld [vmem:[%s1533_s2 + $0xe8] sm:$0xff] }
  0x11   :  { %v79_v58 = vunpack.c.l.b16 %v59_v49  ;;  %154 = vmatpush.bf16.msra.mxu2 %v140_v34  ;;  %v113_v0 = vpack.c.b16 %v111_v52, %v110_v47  ;;  %v80_v1 = vunpack.c.l.b16 %v60_v53  ;;  %v108_v2 = vunpack.c.l.b16 %v63_v54  ;;  %v244_v26 = vld [vmem:[%s1533_s2 + $0x160] sm:$0xff]  ;;  %v245_v31 = vld [vmem:[%s1533_s2 + $0x168] sm:$0xff]  ;;  %v211_v43 = vld [vmem:[%s1533_s2 + $0x58] sm:$0xff] }
  0x12   :  { %97 = vmatpush.bf16.msra.mxu0 %v84_v51  ;;  %v278_v3 = vpack.c.bf16 %v214_v50, %v214_v50  ;;  %182 = vmatpush.bf16.msra.mxu3 %v168_v46  ;;  %v109_v4 = vunpack.c.l.b16 %v64_v59  ;;  %v279_v5 = vpack.c.bf16 %v215_v55, %v215_v55  ;;  %v294_v6 = vpack.c.bf16 %v230_v56, %v230_v56  ;;  %v260_v32 = vld [vmem:[%s1533_s2 + $0x1e0] sm:$0xff]  ;;  %v261_v37 = vld [vmem:[%s1533_s2 + $0x1e8] sm:$0xff]  ;;  %v226_v49 = vld [vmem:[%s1533_s2 + $0xd0] sm:$0xff] }
  0x13   :  { %v295_v7 = vpack.c.bf16 %v231_v57, %v231_v57  ;;  %125 = vmatpush.bf16.msra.mxu1 %v113_v0  ;;  %v83_v10 = vpack.c.b16 %v80_v1, %v79_v58  ;;  %v310_v12 = vpack.c.bf16 %v246_v62, %v246_v62  ;;  %v311_v13 = vpack.c.bf16 %v247_v63, %v247_v63  ;;  %v227_v50 = vld [vmem:[%s1533_s2 + $0xd8] sm:$0xff]  ;;  %v242_v55 = vld [vmem:[%s1533_s2 + $0x150] sm:$0xff] }
  0x14   :  { %v358_v11 = vunpack.c.l.b16 %v278_v3  ;;  %981 = vmatmul.msk.bf16.vlgmr.msra.gmra.mxu2 %vm87_vm0, %v41_v42  ;;  %v112_v16 = vpack.c.b16 %v109_v4, %v108_v2  ;;  %v359_v17 = vunpack.c.l.b16 %v279_v5  ;;  %v419_v18 = vunpack.c.l.b16 %v294_v6  ;;  %v210_v42 = vld [vmem:[%s1533_s2 + $0x50] sm:$0xff]  ;;  %v259_v1 = vld [vmem:[%s1533_s2 + $0x1d8] sm:$0xff]  ;;  %v208_v6 = vld [vmem:[%s1533_s2 + $0x40] sm:$0xff] }
  0x15   :  { %v420_v19 = vunpack.c.l.b16 %v295_v7  ;;  %982 = vmatmul.msk.bf16.vlgmr.msra.gmra.mxu3 %vm87_vm0, %v42_v48  ;;  %v480_v21 = vunpack.c.l.b16 %v310_v12  ;;  %v481_v22 = vunpack.c.l.b16 %v311_v13  ;;  %v326_v23 = vpack.c.bf16 %v262_v8, %v262_v8  ;;  %v258_v0 = vld [vmem:[%s1533_s2 + $0x1d0] sm:$0xff]  ;;  %v209_v7 = vld [vmem:[%s1533_s2 + $0x48] sm:$0xff]  ;;  %v224_v12 = vld [vmem:[%s1533_s2 + $0xc0] sm:$0xff] }
  0x16   :  { %98 = vmatpush.bf16.msra.mxu0 %v83_v10  ;;  %v327_v24 = vpack.c.bf16 %v263_v9, %v263_v9  ;;  %v367_v27 = vpack.c.b16 %v359_v17, %v358_v11  ;;  %v276_v29 = vpack.c.bf16 %v212_v14, %v212_v14  ;;  %v277_v30 = vpack.c.bf16 %v213_v15, %v213_v15  ;;  %v225_v13 = vld [vmem:[%s1533_s2 + $0xc8] sm:$0xff] }
  0x17   :  { %v428_v28 = vpack.c.b16 %v420_v19, %v419_v18  ;;  %126 = vmatpush.bf16.msra.mxu1 %v112_v16  ;;  %v489_v33 = vpack.c.b16 %v481_v22, %v480_v21  ;;  %v541_v34 = vunpack.c.l.b16 %v326_v23  ;;  %v292_v36 = vpack.c.bf16 %v228_v20, %v228_v20  ;;  %v240_v18 = vld [vmem:[%s1533_s2 + $0x140] sm:$0xff]  ;;  %v241_v23 = vld [vmem:[%s1533_s2 + $0x148] sm:$0xff] }
  0x18   :  { %v542_v35 = vunpack.c.l.b16 %v327_v24  ;;  %v356_v38 = vunpack.c.l.b16 %v276_v29  ;;  %v357_v39 = vunpack.c.l.b16 %v277_v30  ;;  %v293_v40 = vpack.c.bf16 %v229_v25, %v229_v25  ;;  %v257_v29 = vld [vmem:[%s1533_s2 + $0x1c8] sm:$0xff] }
  0x19   :  { %979 = vmatmul.msk.bf16.vlgmr.msra.gmra.mxu0 %vm87_vm0, %v39_v60  ;;  %v308_v41 = vpack.c.bf16 %v244_v26, %v244_v26  ;;  %498 = vmatpush.bf16.msrb.mxu2 %v489_v33  ;;  %v417_v46 = vunpack.c.l.b16 %v292_v36  ;;  %v309_v47 = vpack.c.bf16 %v245_v31, %v245_v31  ;;  %v324_v48 = vpack.c.bf16 %v260_v32, %v260_v32  ;;  %v243_v60 = vld [vmem:[%s1533_s2 + $0x158] sm:$0xff] }
  0x1a   :  { %376 = vmatpush.bf16.msrb.mxu0 %v367_v27  ;;  %v550_v44 = vpack.c.b16 %v542_v35, %v541_v34  ;;  %980 = vmatmul.msk.bf16.vlgmr.msra.gmra.mxu1 %vm87_vm0, %v40_v61  ;;  %v366_v51 = vpack.c.b16 %v357_v39, %v356_v38  ;;  %v418_v52 = vunpack.c.l.b16 %v293_v40  ;;  %v325_v54 = vpack.c.bf16 %v261_v37, %v261_v37  ;;  %v206_v34 = vld [vmem:[%s1533_s2 + $0x30] sm:$0xff]  ;;  %v207_v35 = vld [vmem:[%s1533_s2 + $0x38] sm:$0xff] }
  0x1b   :  { %437 = vmatpush.bf16.msrb.mxu1 %v428_v28  ;;  %v478_v53 = vunpack.c.l.b16 %v308_v41  ;;  %v479_v56 = vunpack.c.l.b16 %v309_v47  ;;  %v539_v57 = vunpack.c.l.b16 %v324_v48  ;;  %v274_v58 = vpack.c.bf16 %v210_v42, %v210_v42  ;;  %v256_v28 = vld [vmem:[%s1533_s2 + $0x1c0] sm:$0xff]  ;;  %v222_v40 = vld [vmem:[%s1533_s2 + $0xb0] sm:$0xff]  ;;  %v223_v41 = vld [vmem:[%s1533_s2 + $0xb8] sm:$0xff] }
  0x1c   :  { %559 = vmatpush.bf16.msrb.mxu3 %v550_v44  ;;  %v275_v59 = vpack.c.bf16 %v211_v43, %v211_v43  ;;  %v427_v45 = vpack.c.b16 %v418_v52, %v417_v46  ;;  %v540_v62 = vunpack.c.l.b16 %v325_v54  ;;  %v290_v61 = vpack.c.bf16 %v226_v49, %v226_v49  ;;  %v238_v47 = vld [vmem:[%s1533_s2 + $0x130] sm:$0xff]  ;;  %v239_v52 = vld [vmem:[%s1533_s2 + $0x138] sm:$0xff] }
  0x1d   :  { %v291_v63 = vpack.c.bf16 %v227_v50, %v227_v50  ;;  %v488_v2 = vpack.c.b16 %v479_v56, %v478_v53  ;;  %v354_v3 = vunpack.c.l.b16 %v274_v58  ;;  %v306_v5 = vpack.c.bf16 %v242_v55, %v242_v55  ;;  %v255_v58 = vld [vmem:[%s1533_s2 + $0x1b8] sm:$0xff] }
  0x1e   :  { %377 = vmatpush.bf16.msrb.mxu0 %v366_v51  ;;  %v355_v4 = vunpack.c.l.b16 %v275_v59  ;;  %v549_v8 = vpack.c.b16 %v540_v62, %v539_v57  ;;  %v415_v9 = vunpack.c.l.b16 %v290_v61  ;;  %v307_v11 = vpack.c.bf16 %v243_v60, %v243_v60  ;;  %v254_v57 = vld [vmem:[%s1533_s2 + $0x1b0] sm:$0xff]  ;;  %v204_v61 = vld [vmem:[%s1533_s2 + $0x20] sm:$0xff] }
  0x1f   :  { %438 = vmatpush.bf16.msrb.mxu1 %v427_v45  ;;  %v416_v10 = vunpack.c.l.b16 %v291_v63  ;;  %499 = vmatpush.bf16.msrb.mxu2 %v488_v2  ;;  %v476_v15 = vunpack.c.l.b16 %v306_v5  ;;  %v322_v16 = vpack.c.bf16 %v258_v0, %v258_v0  ;;  %v323_v17 = vpack.c.bf16 %v259_v1, %v259_v1  ;;  %v205_v63 = vld [vmem:[%s1533_s2 + $0x28] sm:$0xff] }
  0x20   :  { %v365_v14 = vpack.c.b16 %v355_v4, %v354_v3  ;;  %560 = vmatpush.bf16.msrb.mxu3 %v549_v8  ;;  %v477_v20 = vunpack.c.l.b16 %v307_v11  ;;  %v272_v21 = vpack.c.bf16 %v208_v6, %v208_v6  ;;  %v273_v22 = vpack.c.bf16 %v209_v7, %v209_v7  ;;  %v220_v4 = vld [vmem:[%s1533_s2 + $0xa0] sm:$0xff]  ;;  %v221_v5 = vld [vmem:[%s1533_s2 + $0xa8] sm:$0xff] }
  0x21   :  { %v426_v19 = vpack.c.b16 %v416_v10, %v415_v9  ;;  %v537_v24 = vunpack.c.l.b16 %v322_v16  ;;  %v538_v25 = vunpack.c.l.b16 %v323_v17  ;;  %v288_v26 = vpack.c.bf16 %v224_v12, %v224_v12  ;;  %v236_v10 = vld [vmem:[%s1533_s2 + $0x120] sm:$0xff] }
  0x22   :  { %378 = vmatpush.bf16.msrb.mxu0 %v365_v14  ;;  %v289_v27 = vpack.c.bf16 %v225_v13, %v225_v13  ;;  %v487_v30 = vpack.c.b16 %v477_v20, %v476_v15  ;;  %v352_v31 = vunpack.c.l.b16 %v272_v21  ;;  %v353_v32 = vunpack.c.l.b16 %v273_v22  ;;  %v237_v15 = vld [vmem:[%s1533_s2 + $0x128] sm:$0xff]  ;;  %v252_v20 = vld [vmem:[%s1533_s2 + $0x1a0] sm:$0xff] }
  0x23   :  { %439 = vmatpush.bf16.msrb.mxu1 %v426_v19  ;;  %v304_v33 = vpack.c.bf16 %v240_v18, %v240_v18  ;;  %v548_v36 = vpack.c.b16 %v538_v25, %v537_v24  ;;  %v413_v37 = vunpack.c.l.b16 %v288_v26  ;;  %v305_v39 = vpack.c.bf16 %v241_v23, %v241_v23  ;;  %v253_v21 = vld [vmem:[%s1533_s2 + $0x1a8] sm:$0xff] }
  0x24   :  { %v414_v38 = vunpack.c.l.b16 %v289_v27  ;;  %500 = vmatpush.bf16.msrb.mxu2 %v487_v30  ;;  %v364_v42 = vpack.c.b16 %v353_v32, %v352_v31  ;;  %v320_v44 = vpack.c.bf16 %v256_v28, %v256_v28  ;;  %v321_v46 = vpack.c.bf16 %v257_v29, %v257_v29 }
  0x25   :  { %v474_v43 = vunpack.c.l.b16 %v304_v33  ;;  %561 = vmatpush.bf16.msrb.mxu3 %v548_v36  ;;  %v475_v49 = vunpack.c.l.b16 %v305_v39  ;;  %v270_v50 = vpack.c.bf16 %v206_v34, %v206_v34  ;;  %v271_v51 = vpack.c.bf16 %v207_v35, %v207_v35 }
  0x26   :  { %v425_v48 = vpack.c.b16 %v414_v38, %v413_v37  ;;  %379 = vmatpush.bf16.msrb.mxu0 %v364_v42  ;;  %v535_v53 = vunpack.c.l.b16 %v320_v44  ;;  %v536_v54 = vunpack.c.l.b16 %v321_v46  ;;  %v286_v55 = vpack.c.bf16 %v222_v40, %v222_v40  ;;  %v202_v40 = vld [vmem:[%s1533_s2 + $0x10] sm:$0xff]  ;;  %v219_v46 = vld [vmem:[%s1533_s2 + $0x98] sm:$0xff] }
  0x27   :  { %v287_v56 = vpack.c.bf16 %v223_v41, %v223_v41  ;;  %v486_v59 = vpack.c.b16 %v475_v49, %v474_v43  ;;  %v350_v60 = vunpack.c.l.b16 %v270_v50  ;;  %v351_v45 = vunpack.c.l.b16 %v271_v51  ;;  %v203_v41 = vld [vmem:[%s1533_s2 + $0x18] sm:$0xff]  ;;  %v218_v42 = vld [vmem:[%s1533_s2 + $0x90] sm:$0xff] }
  0x28   :  { %440 = vmatpush.bf16.msrb.mxu1 %v425_v48  ;;  %v302_v62 = vpack.c.bf16 %v238_v47, %v238_v47  ;;  %v547_v0 = vpack.c.b16 %v536_v54, %v535_v53  ;;  %v411_v1 = vunpack.c.l.b16 %v286_v55  ;;  %v303_v3 = vpack.c.bf16 %v239_v52, %v239_v52  ;;  %v234_v48 = vld [vmem:[%s1533_s2 + $0x110] sm:$0xff]  ;;  %v235_v49 = vld [vmem:[%s1533_s2 + $0x118] sm:$0xff] }
  0x29   :  { %v412_v2 = vunpack.c.l.b16 %v287_v56  ;;  %501 = vmatpush.bf16.msrb.mxu2 %v486_v59  ;;  %v363_v6 = vpack.c.b16 %v351_v45, %v350_v60  ;;  %v318_v8 = vpack.c.bf16 %v254_v57, %v254_v57  ;;  %v319_v9 = vpack.c.bf16 %v255_v58, %v255_v58  ;;  %v250_v53 = vld [vmem:[%s1533_s2 + $0x190] sm:$0xff]  ;;  %v251_v54 = vld [vmem:[%s1533_s2 + $0x198] sm:$0xff] }
  0x2a   :  { %v472_v7 = vunpack.c.l.b16 %v302_v62  ;;  %562 = vmatpush.bf16.msrb.mxu3 %v547_v0  ;;  %v473_v12 = vunpack.c.l.b16 %v303_v3  ;;  %v268_v13 = vpack.c.bf16 %v204_v61, %v204_v61  ;;  %v269_v14 = vpack.c.bf16 %v205_v63, %v205_v63  ;;  %v200_v61 = vld [vmem:[%s1533_s2] sm:$0xff]  ;;  %v201_v63 = vld [vmem:[%s1533_s2 + $0x8] sm:$0xff] }
  0x2b   :  { %v424_v11 = vpack.c.b16 %v412_v2, %v411_v1  ;;  %380 = vmatpush.bf16.msrb.mxu0 %v363_v6  ;;  %v533_v16 = vunpack.c.l.b16 %v318_v8  ;;  %v534_v17 = vunpack.c.l.b16 %v319_v9  ;;  %v284_v18 = vpack.c.bf16 %v220_v4, %v220_v4  ;;  %v216_v0 = vld [vmem:[%s1533_s2 + $0x80] sm:$0xff] }
  0x2c   :  { %v285_v19 = vpack.c.bf16 %v221_v5, %v221_v5  ;;  %v485_v22 = vpack.c.b16 %v473_v12, %v472_v7  ;;  %v348_v23 = vunpack.c.l.b16 %v268_v13  ;;  %v349_v24 = vunpack.c.l.b16 %v269_v14  ;;  %v217_v5 = vld [vmem:[%s1533_s2 + $0x88] sm:$0xff]  ;;  %v232_v6 = vld [vmem:[%s1533_s2 + $0x100] sm:$0xff] }
  0x2d   :  { %441 = vmatpush.bf16.msrb.mxu1 %v424_v11  ;;  %v300_v25 = vpack.c.bf16 %v236_v10, %v236_v10  ;;  %v546_v26 = vpack.c.b16 %v534_v17, %v533_v16  ;;  %v409_v27 = vunpack.c.l.b16 %v284_v18  ;;  %v301_v29 = vpack.c.bf16 %v237_v15, %v237_v15  ;;  %v233_v7 = vld [vmem:[%s1533_s2 + $0x108] sm:$0xff]  ;;  %v248_v12 = vld [vmem:[%s1533_s2 + $0x180] sm:$0xff] }
  0x2e   :  { %v410_v28 = vunpack.c.l.b16 %v285_v19  ;;  %502 = vmatpush.bf16.msrb.mxu2 %v485_v22  ;;  %v362_v30 = vpack.c.b16 %v349_v24, %v348_v23  ;;  %v316_v32 = vpack.c.bf16 %v252_v20, %v252_v20  ;;  %v317_v33 = vpack.c.bf16 %v253_v21, %v253_v21  ;;  %v249_v13 = vld [vmem:[%s1533_s2 + $0x188] sm:$0xff] }
  0x2f   :  { %v470_v31 = vunpack.c.l.b16 %v300_v25  ;;  %563 = vmatpush.bf16.msrb.mxu3 %v546_v26  ;;  %v471_v35 = vunpack.c.l.b16 %v301_v29  ;;  %v266_v43 = vpack.c.bf16 %v202_v40, %v202_v40  ;;  %v267_v44 = vpack.c.bf16 %v203_v41, %v203_v41  ;;  %v597_v40 = vld [vmem:[%s1534_s3 + $0x68] sm:$0xff] }
  0x30   :  { %v423_v34 = vpack.c.b16 %v410_v28, %v409_v27  ;;  %381 = vmatpush.bf16.msrb.mxu0 %v362_v30  ;;  %v531_v36 = vunpack.c.l.b16 %v316_v32  ;;  %v532_v37 = vunpack.c.l.b16 %v317_v33  ;;  %v282_v47 = vpack.c.bf16 %v218_v42, %v218_v42  ;;  %v598_v32 = vld [vmem:[%s1534_s3 + $0x70] sm:$0xff]  ;;  %v599_v33 = vld [vmem:[%s1534_s3 + $0x78] sm:$0xff] }
  0x31   :  { %v484_v38 = vpack.c.b16 %v471_v35, %v470_v31  ;;  %v283_v50 = vpack.c.bf16 %v219_v46, %v219_v46  ;;  %v298_v51 = vpack.c.bf16 %v234_v48, %v234_v48  ;;  %v299_v52 = vpack.c.bf16 %v235_v49, %v235_v49  ;;  %v613_v46 = vld [vmem:[%s1534_s3 + $0xe8] sm:$0xff] }
  0x32   :  { %442 = vmatpush.bf16.msrb.mxu1 %v423_v34  ;;  %v545_v39 = vpack.c.b16 %v532_v37, %v531_v36  ;;  %v346_v55 = vunpack.c.l.b16 %v266_v43  ;;  %v347_v56 = vunpack.c.l.b16 %v267_v44  ;;  %v407_v57 = vunpack.c.l.b16 %v282_v47  ;;  %v614_v34 = vld [vmem:[%s1534_s3 + $0xf0] sm:$0xff]  ;;  %v615_v37 = vld [vmem:[%s1534_s3 + $0xf8] sm:$0xff]  ;;  %v612_v44 = vld [vmem:[%s1534_s3 + $0xe0] sm:$0xff] }
  0x33   :  { %503 = vmatpush.bf16.msrb.mxu2 %v484_v38  ;;  %v314_v58 = vpack.c.bf16 %v250_v53, %v250_v53  ;;  %v408_v59 = vunpack.c.l.b16 %v283_v50  ;;  %v468_v60 = vunpack.c.l.b16 %v298_v51  ;;  %v469_v45 = vunpack.c.l.b16 %v299_v52  ;;  %v630_v47 = vld [vmem:[%s1534_s3 + $0x170] sm:$0xff]  ;;  %v631_v52 = vld [vmem:[%s1534_s3 + $0x178] sm:$0xff] }
  0x34   :  { %564 = vmatpush.bf16.msrb.mxu3 %v545_v39  ;;  %v315_v62 = vpack.c.bf16 %v251_v54, %v251_v54  ;;  %v361_v1 = vpack.c.b16 %v347_v56, %v346_v55  ;;  %v264_v3 = vpack.c.bf16 %v200_v61, %v200_v61  ;;  %v265_v4 = vpack.c.bf16 %v201_v63, %v201_v63  ;;  %v596_v39 = vld [vmem:[%s1534_s3 + $0x60] sm:$0xff]  ;;  %v646_v53 = vld [vmem:[%s1534_s3 + $0x1f0] sm:$0xff]  ;;  %v595_v63 = vld [vmem:[%s1534_s3 + $0x58] sm:$0xff] }
  0x35   :  { %v529_v2 = vunpack.c.l.b16 %v314_v58  ;;  %v422_v8 = vpack.c.b16 %v408_v59, %v407_v57  ;;  %v483_v9 = vpack.c.b16 %v469_v45, %v468_v60  ;;  %v280_v11 = vpack.c.bf16 %v216_v0, %v216_v0  ;;  %v647_v58 = vld [vmem:[%s1534_s3 + $0x1f8] sm:$0xff]  ;;  %v594_v59 = vld [vmem:[%s1534_s3 + $0x50] sm:$0xff] }
  0x36   :  { %v530_v10 = vunpack.c.l.b16 %v315_v62  ;;  %382 = vmatpush.bf16.msrb.mxu0 %v361_v1  ;;  %v344_v14 = vunpack.c.l.b16 %v264_v3  ;;  %v345_v15 = vunpack.c.l.b16 %v265_v4  ;;  %v281_v16 = vpack.c.bf16 %v217_v5, %v217_v5  ;;  %v610_v0 = vld [vmem:[%s1534_s3 + $0xd0] sm:$0xff]  ;;  %v611_v5 = vld [vmem:[%s1534_s3 + $0xd8] sm:$0xff] }
  0x37   :  { %v296_v17 = vpack.c.bf16 %v232_v6, %v232_v6  ;;  %443 = vmatpush.bf16.msrb.mxu1 %v422_v8  ;;  %504 = vmatpush.bf16.msrb.mxu2 %v483_v9  ;;  %v405_v19 = vunpack.c.l.b16 %v280_v11  ;;  %v297_v20 = vpack.c.bf16 %v233_v7, %v233_v7  ;;  %v312_v21 = vpack.c.bf16 %v248_v12, %v248_v12  ;;  %v629_v11 = vld [vmem:[%s1534_s3 + $0x168] sm:$0xff] }
  0x38   :  { %v544_v18 = vpack.c.b16 %v530_v10, %v529_v2  ;;  %v360_v22 = vpack.c.b16 %v345_v15, %v344_v14  ;;  %v406_v23 = vunpack.c.l.b16 %v281_v16  ;;  %v313_v25 = vpack.c.bf16 %v249_v13, %v249_v13  ;;  %v628_v10 = vld [vmem:[%s1534_s3 + $0x160] sm:$0xff] }
  0x39   :  { %v466_v24 = vunpack.c.l.b16 %v296_v17  ;;  %v467_v26 = vunpack.c.l.b16 %v297_v20  ;;  %v527_v27 = vunpack.c.l.b16 %v312_v21  ;;  %v662_v35 = vpack.c.bf16 %v598_v32, %v598_v32  ;;  %v644_v16 = vld [vmem:[%s1534_s3 + $0x1e0] sm:$0xff]  ;;  %v645_v17 = vld [vmem:[%s1534_s3 + $0x1e8] sm:$0xff] }
  0x3a   :  { %565 = vmatpush.bf16.msrb.mxu3 %v544_v18  ;;  %383 = vmatpush.bf16.msrb.mxu0 %v360_v22  ;;  %v421_v28 = vpack.c.b16 %v406_v23, %v405_v19  ;;  %v528_v29 = vunpack.c.l.b16 %v313_v25  ;;  %v663_v36 = vpack.c.bf16 %v599_v33, %v599_v33  ;;  %v678_v38 = vpack.c.bf16 %v614_v34, %v614_v34  ;;  %v592_v22 = vld [vmem:[%s1534_s3 + $0x40] sm:$0xff]  ;;  %v609_v33 = vld [vmem:[%s1534_s3 + $0xc8] sm:$0xff] }
  0x3b   :  { %v482_v30 = vpack.c.b16 %v467_v26, %v466_v24  ;;  %v679_v41 = vpack.c.bf16 %v615_v37, %v615_v37  ;;  %v660_v42 = vpack.c.bf16 %v596_v39, %v596_v39  ;;  %v661_v43 = vpack.c.bf16 %v597_v40, %v597_v40  ;;  %v608_v32 = vld [vmem:[%s1534_s3 + $0xc0] sm:$0xff]  ;;  %v627_v39 = vld [vmem:[%s1534_s3 + $0x158] sm:$0xff] }
  0x3c   :  { %444 = vmatpush.bf16.msrb.mxu1 %v421_v28  ;;  %v543_v31 = vpack.c.b16 %v528_v29, %v527_v27  ;;  %v742_v48 = vunpack.c.l.b16 %v662_v35  ;;  %v743_v49 = vunpack.c.l.b16 %v663_v36  ;;  %v803_v50 = vunpack.c.l.b16 %v678_v38  ;;  %v593_v27 = vld [vmem:[%s1534_s3 + $0x48] sm:$0xff]  ;;  %v626_v38 = vld [vmem:[%s1534_s3 + $0x150] sm:$0xff] }
  0x3d   :  { %505 = vmatpush.bf16.msrb.mxu2 %v482_v30  ;;  %v676_v51 = vpack.c.bf16 %v612_v44, %v612_v44  ;;  %v804_v54 = vunpack.c.l.b16 %v679_v41  ;;  %v740_v55 = vunpack.c.l.b16 %v660_v42  ;;  %v741_v56 = vunpack.c.l.b16 %v661_v43  ;;  %v642_v44 = vld [vmem:[%s1534_s3 + $0x1d0] sm:$0xff] }
  0x3e   :  { %566 = vmatpush.bf16.msrb.mxu3 %v543_v31  ;;  %v677_v57 = vpack.c.bf16 %v613_v46, %v613_v46  ;;  %v751_v60 = vpack.c.b16 %v743_v49, %v742_v48  ;;  %v694_v62 = vpack.c.bf16 %v630_v47, %v630_v47  ;;  %v695_v61 = vpack.c.bf16 %v631_v52, %v631_v52  ;;  %v643_v46 = vld [vmem:[%s1534_s3 + $0x1d8] sm:$0xff] }
  0x3f   :  { %v801_v45 = vunpack.c.l.b16 %v676_v51  ;;  %v812_v1 = vpack.c.b16 %v804_v54, %v803_v50  ;;  %v750_v2 = vpack.c.b16 %v741_v56, %v740_v55  ;;  %v710_v4 = vpack.c.bf16 %v646_v53, %v646_v53  ;;  %v590_v51 = vld [vmem:[%s1534_s3 + $0x30] sm:$0xff]  ;;  %v591_v56 = vld [vmem:[%s1534_s3 + $0x38] sm:$0xff] }
  0x40   :  { %v802_v3 = vunpack.c.l.b16 %v677_v57  ;;  %760 = vmatpush.bf16.msra.mxu0 %v751_v60  ;;  %v864_v6 = vunpack.c.l.b16 %v694_v62  ;;  %v865_v7 = vunpack.c.l.b16 %v695_v61  ;;  %v711_v8 = vpack.c.bf16 %v647_v58, %v647_v58  ;;  %v607_v62 = vld [vmem:[%s1534_s3 + $0xb8] sm:$0xff] }
  0x41   :  { %v658_v9 = vpack.c.bf16 %v594_v59, %v594_v59  ;;  %821 = vmatpush.bf16.msra.mxu1 %v812_v1  ;;  %v925_v13 = vunpack.c.l.b16 %v710_v4  ;;  %v659_v14 = vpack.c.bf16 %v595_v63, %v595_v63  ;;  %v674_v15 = vpack.c.bf16 %v610_v0, %v610_v0 }
  0x42   :  { %v811_v12 = vpack.c.b16 %v802_v3, %v801_v45  ;;  %v873_v18 = vpack.c.b16 %v865_v7, %v864_v6  ;;  %v926_v19 = vunpack.c.l.b16 %v711_v8  ;;  %v675_v21 = vpack.c.bf16 %v611_v5, %v611_v5  ;;  %v606_v45 = vld [vmem:[%s1534_s3 + $0xb0] sm:$0xff]  ;;  %v625_v3 = vld [vmem:[%s1534_s3 + $0x148] sm:$0xff]  ;;  %v640_v8 = vld [vmem:[%s1534_s3 + $0x1c0] sm:$0xff] }
  0x43   :  { %v738_v20 = vunpack.c.l.b16 %v658_v9  ;;  %v739_v23 = vunpack.c.l.b16 %v659_v14  ;;  %v799_v24 = vunpack.c.l.b16 %v674_v15  ;;  %v692_v25 = vpack.c.bf16 %v628_v10, %v628_v10  ;;  %v641_v9 = vld [vmem:[%s1534_s3 + $0x1c8] sm:$0xff] }
  0x44   :  { %v693_v26 = vpack.c.bf16 %v629_v11, %v629_v11  ;;  %761 = vmatpush.bf16.msra.mxu0 %v750_v2  ;;  %882 = vmatpush.bf16.msra.mxu2 %v873_v18  ;;  %v934_v28 = vpack.c.b16 %v926_v19, %v925_v13  ;;  %v800_v29 = vunpack.c.l.b16 %v675_v21  ;;  %v708_v30 = vpack.c.bf16 %v644_v16, %v644_v16  ;;  %v624_v2 = vld [vmem:[%s1534_s3 + $0x140] sm:$0xff] }
  0x45   :  { %v709_v31 = vpack.c.bf16 %v645_v17, %v645_v17  ;;  %822 = vmatpush.bf16.msra.mxu1 %v811_v12  ;;  %v749_v34 = vpack.c.b16 %v739_v23, %v738_v20  ;;  %v862_v35 = vunpack.c.l.b16 %v692_v25  ;;  %v656_v37 = vpack.c.bf16 %v592_v22, %v592_v22  ;;  %v588_v18 = vld [vmem:[%s1534_s3 + $0x20] sm:$0xff] }
  0x46   :  { %v863_v36 = vunpack.c.l.b16 %v693_v26  ;;  %943 = vmatpush.bf16.msra.mxu3 %v934_v28  ;;  %v810_v40 = vpack.c.b16 %v800_v29, %v799_v24  ;;  %v923_v41 = vunpack.c.l.b16 %v708_v30  ;;  %v657_v43 = vpack.c.bf16 %v593_v27, %v593_v27  ;;  %v589_v28 = vld [vmem:[%s1534_s3 + $0x28] sm:$0xff] }
  0x47   :  { %v924_v42 = vunpack.c.l.b16 %v709_v31  ;;  %v736_v48 = vunpack.c.l.b16 %v656_v37  ;;  %v672_v49 = vpack.c.bf16 %v608_v32, %v608_v32  ;;  %v673_v50 = vpack.c.bf16 %v609_v33, %v609_v33 }
  0x48   :  { %v872_v47 = vpack.c.b16 %v863_v36, %v862_v35  ;;  %762 = vmatpush.bf16.msra.mxu0 %v749_v34  ;;  %v737_v53 = vunpack.c.l.b16 %v657_v43  ;;  %v690_v54 = vpack.c.bf16 %v626_v38, %v626_v38  ;;  %v691_v55 = vpack.c.bf16 %v627_v39, %v627_v39  ;;  %v604_v35 = vld [vmem:[%s1534_s3 + $0xa0] sm:$0xff] }
  0x49   :  { %v933_v52 = vpack.c.b16 %v924_v42, %v923_v41  ;;  %823 = vmatpush.bf16.msra.mxu1 %v810_v40  ;;  %v797_v57 = vunpack.c.l.b16 %v672_v49  ;;  %v798_v58 = vunpack.c.l.b16 %v673_v50  ;;  %v706_v59 = vpack.c.bf16 %v642_v44, %v642_v44  ;;  %v605_v41 = vld [vmem:[%s1534_s3 + $0xa8] sm:$0xff]  ;;  %v622_v42 = vld [vmem:[%s1534_s3 + $0x130] sm:$0xff] }
  0x4a   :  { %883 = vmatpush.bf16.msra.mxu2 %v872_v47  ;;  %v707_v60 = vpack.c.bf16 %v643_v46, %v643_v46  ;;  %v748_v61 = vpack.c.b16 %v737_v53, %v736_v48  ;;  %v860_v63 = vunpack.c.l.b16 %v690_v54  ;;  %v861_v0 = vunpack.c.l.b16 %v691_v55  ;;  %v623_v48 = vld [vmem:[%s1534_s3 + $0x138] sm:$0xff] }
  0x4b   :  { %944 = vmatpush.bf16.msra.mxu3 %v933_v52  ;;  %v654_v1 = vpack.c.bf16 %v590_v51, %v590_v51  ;;  %v809_v4 = vpack.c.b16 %v798_v58, %v797_v57  ;;  %v921_v5 = vunpack.c.l.b16 %v706_v59  ;;  %v655_v7 = vpack.c.bf16 %v591_v56, %v591_v56  ;;  %v638_v57 = vld [vmem:[%s1534_s3 + $0x1b0] sm:$0xff]  ;;  %v639_v58 = vld [vmem:[%s1534_s3 + $0x1b8] sm:$0xff] }
  0x4c   :  { %v922_v6 = vunpack.c.l.b16 %v707_v60  ;;  %763 = vmatpush.bf16.msra.mxu0 %v748_v61  ;;  %v871_v10 = vpack.c.b16 %v861_v0, %v860_v63  ;;  %v670_v12 = vpack.c.bf16 %v606_v45, %v606_v45  ;;  %v671_v13 = vpack.c.bf16 %v607_v62, %v607_v62 }
  0x4d   :  { %v734_v11 = vunpack.c.l.b16 %v654_v1  ;;  %824 = vmatpush.bf16.msra.mxu1 %v809_v4  ;;  %v735_v15 = vunpack.c.l.b16 %v655_v7  ;;  %v688_v16 = vpack.c.bf16 %v624_v2, %v624_v2  ;;  %v689_v17 = vpack.c.bf16 %v625_v3, %v625_v3 }
  0x4e   :  { %v932_v14 = vpack.c.b16 %v922_v6, %v921_v5  ;;  %884 = vmatpush.bf16.msra.mxu2 %v871_v10  ;;  %v795_v20 = vunpack.c.l.b16 %v670_v12  ;;  %v796_v21 = vunpack.c.l.b16 %v671_v13  ;;  %v704_v22 = vpack.c.bf16 %v640_v8, %v640_v8 }
  0x4f   :  { %v705_v23 = vpack.c.bf16 %v641_v9, %v641_v9  ;;  %v747_v25 = vpack.c.b16 %v735_v15, %v734_v11  ;;  %v858_v26 = vunpack.c.l.b16 %v688_v16  ;;  %v859_v27 = vunpack.c.l.b16 %v689_v17  ;;  %v587_v15 = vld [vmem:[%s1534_s3 + $0x18] sm:$0xff]  ;;  %v602_v16 = vld [vmem:[%s1534_s3 + $0x90] sm:$0xff] }
  0x50   :  { %945 = vmatpush.bf16.msra.mxu3 %v932_v14  ;;  %v808_v31 = vpack.c.b16 %v796_v21, %v795_v20  ;;  %v919_v32 = vunpack.c.l.b16 %v704_v22  ;;  %v652_v34 = vpack.c.bf16 %v588_v18, %v588_v18  ;;  %v653_v46 = vpack.c.bf16 %v589_v28, %v589_v28  ;;  %v586_v14 = vld [vmem:[%s1534_s3 + $0x10] sm:$0xff]  ;;  %v620_v22 = vld [vmem:[%s1534_s3 + $0x120] sm:$0xff] }
  0x51   :  { %v920_v33 = vunpack.c.l.b16 %v705_v23  ;;  %764 = vmatpush.bf16.msra.mxu0 %v747_v25  ;;  %v870_v40 = vpack.c.b16 %v859_v27, %v858_v26  ;;  %v668_v52 = vpack.c.bf16 %v604_v35, %v604_v35  ;;  %v669_v55 = vpack.c.bf16 %v605_v41, %v605_v41  ;;  %v621_v23 = vld [vmem:[%s1534_s3 + $0x128] sm:$0xff] }
  0x52   :  { %825 = vmatpush.bf16.msra.mxu1 %v808_v31  ;;  %v732_v47 = vunpack.c.l.b16 %v652_v34  ;;  %v733_v54 = vunpack.c.l.b16 %v653_v46  ;;  %v686_v56 = vpack.c.bf16 %v622_v42, %v622_v42  ;;  %v687_v62 = vpack.c.bf16 %v623_v48, %v623_v48  ;;  %v584_v34 = vld [vmem:[%s1534_s3] sm:$0xff]  ;;  %v585_v35 = vld [vmem:[%s1534_s3 + $0x8] sm:$0xff]  ;;  %v619_v48 = vld [vmem:[%s1534_s3 + $0x118] sm:$0xff] }
  0x53   :  { %v931_v44 = vpack.c.b16 %v920_v33, %v919_v32  ;;  %885 = vmatpush.bf16.msra.mxu2 %v870_v40  ;;  %v793_v45 = vunpack.c.l.b16 %v668_v52  ;;  %v794_v1 = vunpack.c.l.b16 %v669_v55  ;;  %v702_v4 = vpack.c.bf16 %v638_v57, %v638_v57  ;;  %v601_v41 = vld [vmem:[%s1534_s3 + $0x88] sm:$0xff] }
  0x54   :  { %v746_v0 = vpack.c.b16 %v733_v54, %v732_v47  ;;  %v856_v2 = vunpack.c.l.b16 %v686_v56  ;;  %v857_v3 = vunpack.c.l.b16 %v687_v62  ;;  %v703_v5 = vpack.c.bf16 %v639_v58, %v639_v58  ;;  %v618_v47 = vld [vmem:[%s1534_s3 + $0x110] sm:$0xff]  ;;  %v635_v54 = vld [vmem:[%s1534_s3 + $0x198] sm:$0xff] }
  0x55   :  { %946 = vmatpush.bf16.msra.mxu3 %v931_v44  ;;  %v807_v8 = vpack.c.b16 %v794_v1, %v793_v45  ;;  %v917_v11 = vunpack.c.l.b16 %v702_v4  ;;  %v650_v17 = vpack.c.bf16 %v586_v14, %v586_v14  ;;  %v651_v18 = vpack.c.bf16 %v587_v15, %v587_v15  ;;  %v616_v1 = vld [vmem:[%s1534_s3 + $0x100] sm:$0xff] }
  0x56   :  { %765 = vmatpush.bf16.msra.mxu0 %v746_v0  ;;  %v869_v10 = vpack.c.b16 %v857_v3, %v856_v2  ;;  %v918_v12 = vunpack.c.l.b16 %v703_v5  ;;  %v666_v20 = vpack.c.bf16 %v602_v16, %v602_v16  ;;  %v684_v28 = vpack.c.bf16 %v620_v22, %v620_v22  ;;  %v617_v2 = vld [vmem:[%s1534_s3 + $0x108] sm:$0xff]  ;;  %v632_v3 = vld [vmem:[%s1534_s3 + $0x180] sm:$0xff] }
  0x57   :  { %826 = vmatpush.bf16.msra.mxu1 %v807_v8  ;;  %v730_v25 = vunpack.c.l.b16 %v650_v17  ;;  %v731_v26 = vunpack.c.l.b16 %v651_v18  ;;  %v685_v31 = vpack.c.bf16 %v621_v23, %v621_v23  ;;  %v649_v40 = vpack.c.bf16 %v585_v35, %v585_v35  ;;  %v633_v8 = vld [vmem:[%s1534_s3 + $0x188] sm:$0xff] }
  0x58   :  { %886 = vmatpush.bf16.msra.mxu2 %v869_v10  ;;  %v930_v13 = vpack.c.b16 %v918_v12, %v917_v11  ;;  %v791_v27 = vunpack.c.l.b16 %v666_v20  ;;  %v682_v57 = vpack.c.bf16 %v618_v47, %v618_v47  ;;  %v683_v58 = vpack.c.bf16 %v619_v48, %v619_v48 }
  0x59   :  { %v699_v0 = vpack.c.bf16 %v635_v54, %v635_v54  ;;  %v696_v11 = vpack.c.bf16 %v632_v3, %v632_v3  ;;  %v697_v12 = vpack.c.bf16 %v633_v8, %v633_v8 }
  0x5a   :  { %947 = vmatpush.bf16.msra.mxu3 %v930_v13 }
  0x5b   :  { %v914_v10 = vunpack.c.l.b16 %v699_v0  ;;  %v911_v16 = vunpack.c.l.b16 %v696_v11  ;;  %v912_v17 = vunpack.c.l.b16 %v697_v12 }
  0x96   :  { %v100_v19 = vpop.f32.mrf.mxu0 }
  0x97   :  { %v188_v24 = vmul.f32 0.01, %v100_v19  ;;  %v128_v29 = vpop.f32.mrf.mxu1  ;;  %v156_v30 = vpop.f32.mrf.mxu2 }
  0x98   :  { %v189_v37 = vmul.f32 0.01, %v128_v29  ;;  %v190_v38 = vmul.f32 0.01, %v156_v30  ;;  %v184_v39 = vpop.f32.mrf.mxu3 }
  0x99   :  { %v192_v36 = vmax.f32 %v100_v19, %v188_v24  ;;  %v191_v43 = vmul.f32 0.01, %v184_v39  ;;  %v603_v19 = vld [vmem:[%s1534_s3 + $0x98] sm:$0xff]  ;;  %v636_v24 = vld [vmem:[%s1534_s3 + $0x1a0] sm:$0xff] }
  0x9a   :  { %v193_v50 = vmax.f32 %v128_v29, %v189_v37  ;;  %v194_v51 = vmax.f32 %v156_v30, %v190_v38  ;;  %v667_v21 = vpack.c.bf16 %v603_v19, %v603_v19  ;;  %v637_v29 = vld [vmem:[%s1534_s3 + $0x1a8] sm:$0xff]  ;;  %v700_v32 = vpack.c.bf16 %v636_v24, %v636_v24 }
  0x9b   :  { %v196_v49 = vpack.c.bf16 %v192_v36, %v192_v36  ;;  %v195_v53 = vmax.f32 %v184_v39, %v191_v43  ;;  %v701_v33 = vpack.c.bf16 %v637_v29, %v637_v29  ;;  %v600_v36 = vld [vmem:[%s1534_s3 + $0x80] sm:$0xff]  ;;  %v745_v37 = vpack.c.b16 %v731_v26, %v730_v25 }
  0x9c   :  { %v197_v59 = vpack.c.bf16 %v193_v50, %v193_v50  ;;  %v198_v60 = vpack.c.bf16 %v194_v51, %v194_v51  ;;  %v792_v30 = vunpack.c.l.b16 %v667_v21  ;;  %v854_v38 = vunpack.c.l.b16 %v684_v28 }
  0x9d   :  { %384 = vmatmul.bf16.vlgmr.msrb.gmra.mxu0 %v196_v49  ;;  %v199_v61 = vpack.c.bf16 %v195_v53, %v195_v53  ;;  %v648_v39 = vpack.c.bf16 %v584_v34, %v584_v34  ;;  %v855_v43 = vunpack.c.l.b16 %v685_v31  ;;  %v915_v44 = vunpack.c.l.b16 %v700_v32  ;;  %v634_v49 = vld [vmem:[%s1534_s3 + $0x190] sm:$0xff]  ;;  %s1042_s3 = smov [#allocation5]  }
  0x9e   :  { %v102_v63 = vpop.f32.mrf.mxu0  ;;  %445 = vmatmul.bf16.vlgmr.msrb.gmra.mxu1 %v197_v59  ;;  %506 = vmatmul.bf16.vlgmr.msrb.gmra.mxu2 %v198_v60  ;;  %v806_v42 = vpack.c.b16 %v792_v30, %v791_v27  ;;  %v916_v46 = vunpack.c.l.b16 %v701_v33  ;;  %v729_v51 = vunpack.c.l.b16 %v649_v40  ;;  %v664_v52 = vpack.c.bf16 %v600_v36, %v600_v36  ;;  %s964_s18 = sshll.u32 %s1042_s3, 4  ;;  %s965_s18 = int_to_ptr.vmem [resolvable:$true] %s964_s18 }
  0x9f   :  { %567 = vmatmul.bf16.vlgmr.msrb.gmra.mxu3 %v199_v61  ;;  %v158_v6 = vpop.f32.mrf.mxu2  ;;  %v130_v7 = vpop.f32.mrf.mxu1  ;;  %766 = vmatpush.bf16.msra.mxu0 %v745_v37  ;;  %v728_v50 = vunpack.c.l.b16 %v648_v39  ;;  %v665_v53 = vpack.c.bf16 %v601_v41, %v601_v41  ;;  %v868_v55 = vpack.c.b16 %v855_v43, %v854_v38  ;;  %v698_v62 = vpack.c.bf16 %v634_v49, %v634_v49 }
  0xa0   :  { %v186_v9 = vpop.f32.mrf.mxu3  ;;  %827 = vmatpush.bf16.msra.mxu1 %v806_v42  ;;  %v929_v56 = vpack.c.b16 %v916_v46, %v915_v44  ;;  %v789_v60 = vunpack.c.l.b16 %v664_v52  ;;  %v852_v61 = vunpack.c.l.b16 %v682_v57  ;;  %v853_v63 = vunpack.c.l.b16 %v683_v58 }
  0xa1   :  { %v744_v59 = vpack.c.b16 %v729_v51, %v728_v50  ;;  %v790_v45 = vunpack.c.l.b16 %v665_v53  ;;  %887 = vmatpush.bf16.msra.mxu2 %v868_v55  ;;  %v913_v5 = vunpack.c.l.b16 %v698_v62  ;;  %v680_v6 = vpack.c.bf16 %v616_v1, %v616_v1 }
  0xa2   :  { %948 = vmatpush.bf16.msra.mxu3 %v929_v56  ;;  %v681_v7 = vpack.c.bf16 %v617_v2, %v617_v2  ;;  %v867_v9 = vpack.c.b16 %v853_v63, %v852_v61  ;;  %v927_v19 = vpack.c.b16 %v912_v17, %v911_v16 }
  0xa3   :  { %767 = vmatpush.bf16.msra.mxu0 %v744_v59  ;;  %v805_v4 = vpack.c.b16 %v790_v45, %v789_v60  ;;  %v850_v13 = vunpack.c.l.b16 %v680_v6  ;;  %v928_v15 = vpack.c.b16 %v914_v10, %v913_v5 }
  0xa4   :  { %v851_v14 = vunpack.c.l.b16 %v681_v7 }
  0xa5   :  { %828 = vmatpush.bf16.msra.mxu1 %v805_v4  ;;  %888 = vmatpush.bf16.msra.mxu2 %v867_v9 }
  0xa6   :  { %v866_v18 = vpack.c.b16 %v851_v14, %v850_v13  ;;  %949 = vmatpush.bf16.msra.mxu3 %v928_v15 }
  0xa9   :  { %889 = vmatpush.bf16.msra.mxu2 %v866_v18 }
  0xaa   :  { %950 = vmatpush.bf16.msra.mxu3 %v927_v19 }
 0x11a   :  { %v385_v20 = vpop.f32.mrf.mxu0 }
 0x11b   :  { %v572_v21 = vmul.f32 0.01, %v385_v20  ;;  %v446_v22 = vpop.f32.mrf.mxu1 }
 0x11c   :  { %v573_v24 = vmul.f32 0.01, %v446_v22 }
 0x11d   :  { %v576_v23 = vmax.f32 %v385_v20, %v572_v21 }
 0x11e   :  { %v577_v26 = vmax.f32 %v446_v22, %v573_v24 }
 0x11f   :  { %v580_v25 = vpack.c.bf16 %v576_v23, %v576_v23 }
 0x120   :  { %v581_v27 = vpack.c.bf16 %v577_v26, %v577_v26 }
 0x121   :  { %768 = vmatmul.bf16.vlgmr.msra.gmra.mxu0 %v580_v25  ;;  %v507_v28 = vpop.f32.mrf.mxu2 }
 0x122   :  { %v387_v29 = vpop.f32.mrf.mxu0  ;;  %v574_v30 = vmul.f32 0.01, %v507_v28  ;;  %v568_v31 = vpop.f32.mrf.mxu3  ;;  %829 = vmatmul.bf16.vlgmr.msra.gmra.mxu1 %v581_v27 }
 0x123   :  { %v575_v32 = vmul.f32 0.01, %v568_v31  ;;  %v448_v33 = vpop.f32.mrf.mxu1 }
 0x124   :  { %v578_v34 = vmax.f32 %v507_v28, %v574_v30 }
 0x125   :  { %v579_v35 = vmax.f32 %v568_v31, %v575_v32 }
 0x126   :  { %v582_v36 = vpack.c.bf16 %v578_v34, %v578_v34 }
 0x127   :  { %v583_v37 = vpack.c.bf16 %v579_v35, %v579_v35 }
 0x128   :  { %890 = vmatmul.bf16.vlgmr.msra.gmra.mxu2 %v582_v36 }
 0x129   :  { %951 = vmatmul.bf16.vlgmr.msra.gmra.mxu3 %v583_v37  ;;  %v509_v38 = vpop.f32.mrf.mxu2 }
 0x12a   :  { %v570_v39 = vpop.f32.mrf.mxu3 }
 0x19e   :  { %v769_v40 = vpop.f32.mrf.mxu0 }
 0x19f   :  { %956 = vst.msk [vmem:[#allocation5] sm:$0xff] %vm87_vm0, %v769_v40  ;;  %v830_v41 = vpop.f32.mrf.mxu1 }
 0x1a0   :  { %957 = vst.msk [vmem:[#allocation5 + $0x8] sm:$0xff] %vm87_vm0, %v830_v41 }
 0x1a6   :  { %v771_v42 = vpop.f32.mrf.mxu0 }
 0x1a7   :  { %v832_v43 = vpop.f32.mrf.mxu1 }
 0x1ab   :  { %v891_v44 = vpop.f32.mrf.mxu2 }
 0x1ac   :  { %958 = vst.msk [vmem:[#allocation5 + $0x10] sm:$0xff] %vm87_vm0, %v891_v44  ;;  %v952_v46 = vpop.f32.mrf.mxu3 }
 0x1ad   :  { %959 = vst.msk [vmem:[#allocation5 + $0x18] sm:$0xff] %vm87_vm0, %v952_v46 }
 0x1ae   :  { %972 = dma.vmem_to_hbm [thread:$0]  %s965_s18, 512, %s967_s23, [#allocation4], %s1040_s20, %s1040_s20, %s1041_s21  }
 0x1b3   :  { %v893_v47 = vpop.f32.mrf.mxu2 }
 0x1b4   :  { %v954_v48 = vpop.f32.mrf.mxu3 }
 0x1b5   :  { %1037 = dma.done.wait [#allocation4], 512  }
 0x1b6   :  { %1038 = vsyncadd [#allocation4], 4294966784 }
 0x1b7   :  { %977 = vsyncpa [#allocation3], 1 }
 0x1b8   :  { %978 = vsyncpa [#allocation4], 1 }

</bundles_post_ra>
